<compile_context>
chip_gen: v7x
topology: tpu7x:2x2x1
jax: 0.10.0
libtpu: 0.0.40
codegen_flags: <defaults>
</compile_context>

<pallas_src>
import jax
import jax.numpy as jnp
from jax.experimental import pallas as pl
from jax.experimental.pallas import tpu as pltpu


def _focal_partial_kernel(n_ref, logits_ref, target_ref, out_ref):
    """One grid step: partial sum of per-row NLL over this batch tile.

    n_ref:      (1,)        int32 SMEM (true batch size, scalar-prefetched)
    logits_ref: (TN, C)     input-dtype VMEM tile (C = full class dim, no pad)
    target_ref: (TN, 1)     int32 VMEM tile
    out_ref:    (1, 8, 128) f32 VMEM (this block's partial NLL sum, broadcast)
    """
    pid = pl.program_id(0)
    block_rows = logits_ref.shape[0]

    x = logits_ref[...].astype(jnp.float32)                  # (TN, C) f32
    tgt = target_ref[...]                                     # (TN, 1) int32

    # Numerically-stable logsumexp along the class axis (full C lanes; the
    # class axis is never padded so no fill-value masking is needed).
    m = jnp.max(x, axis=-1, keepdims=True)                    # (TN, 1)
    shifted = x - m                                           # (TN, C)
    lse = jnp.log(jnp.sum(jnp.exp(shifted), axis=-1, keepdims=True))  # (TN, 1)

    # Target logit gathered from the already-shifted values via a masked sum
    # (the max m cancels:  (m + lse) - logit_t == lse - shifted_t).
    col = jax.lax.broadcasted_iota(jnp.int32, shifted.shape, 1)
    shifted_t = jnp.sum(jnp.where(col == tgt, shifted, 0.0),
                        axis=-1, keepdims=True)                # (TN, 1)

    nll = lse - shifted_t                                      # (TN, 1)

    # Mask rows past the true batch size.  The ragged last tile reads garbage
    # (possibly inf/NaN) in its out-of-bounds rows; `where` drops those rows
    # element-wise before the reduction, so they never reach the sum.
    row = jax.lax.broadcasted_iota(jnp.int32, nll.shape, 0) + pid * block_rows
    nll = jnp.where(row < n_ref[0], nll, 0.0)

    # Lane-dense (8,128)-aligned output tile; wrapper reads element [i, 0, 0].
    out_ref[...] = jnp.broadcast_to(jnp.sum(nll), (1, 8, 128))


def focal_loss(logits, target, gamma=2.0, block_rows=None,
               tile_bytes=512 * 1024):
    """Pallas TPU implementation of FocalLoss(gamma).forward(logits, target).

    logits: (N, C) floating array (f32 or bf16 — streamed in its native dtype)
    target: (N,)   integer class indices
    """
    n, c = logits.shape
    if not jnp.issubdtype(logits.dtype, jnp.floating):
        logits = logits.astype(jnp.float32)
    dtype = logits.dtype
    itemsize = jnp.dtype(dtype).itemsize

    # Row tile: ONE logits buffer stays <= tile_bytes in native dtype, counting
    # the 128-lane VMEM padding of the class axis.  The in-kernel f32 chain
    # (cast, shift, exp, iota/where) materializes ~4-6 block-sized f32
    # temporaries, so 512 KiB native tiles keep peak VMEM well under the 32 MiB
    # scoped limit on every generation while staying in the >=512-row
    # HBM-roofline regime for typical class counts.
    c_lanes = ((c + 127) // 128) * 128
    if block_rows is None:
        tn = tile_bytes // (c_lanes * itemsize)
        tn = max(8, min(1024, (tn // 8) * 8))
    else:
        tn = max(8, (int(block_rows) // 8) * 8)
    tn = min(tn, max(8, ((n + 7) // 8) * 8))

    # Only tiny batches (< 8 rows, below the sublane minimum) get padded; the
    # big logits array is otherwise streamed as-is with NO wrapper-side pad.
    if n < 8:
        logits = jnp.pad(logits, ((0, 8 - n), (0, 0)))
        target = jnp.pad(target, (0, 8 - n))

    target2d = target.astype(jnp.int32).reshape(-1, 1)
    n_rows = logits.shape[0]
    num_blocks = (n_rows + tn - 1) // tn

    grid_spec = pltpu.PrefetchScalarGridSpec(
        num_scalar_prefetch=1,                      # true batch size -> SMEM
        grid=(num_blocks,),
        in_specs=[
            pl.BlockSpec((tn, c), lambda i, n_sref: (i, 0)),   # logits tile
            pl.BlockSpec((tn, 1), lambda i, n_sref: (i, 0)),   # target tile
        ],
        out_specs=pl.BlockSpec((1, 8, 128), lambda i, n_sref: (i, 0, 0)),
    )

    partials = pl.pallas_call(
        _focal_partial_kernel,
        out_shape=jax.ShapeDtypeStruct((num_blocks, 8, 128), jnp.float32),
        grid_spec=grid_spec,
        compiler_params=pltpu.CompilerParams(
            dimension_semantics=("parallel",),      # independent blocks -> megacore on v7x
            vmem_limit_bytes=32 * 1024 * 1024),
    )(jnp.array([n], dtype=jnp.int32), logits, target2d)

    # Finalize in the wrapper: tree-reduce the per-block partial sums, then
    # apply the focal modulation to the MEAN cross-entropy exactly like the
    # PyTorch module (final .mean() of a scalar is the identity).
    logp = jnp.sum(partials[:, 0, 0]) / jnp.float32(n)
    p = jnp.exp(-logp)
    omp = 1.0 - p
    if float(gamma) == 2.0:
        mod = omp * omp                 # cheap + robust (no pow/log underflow)
    else:
        mod = omp ** jnp.float32(gamma)
    return mod * logp


def _focal_loss_ref(logits, target, gamma=2.0):
    """Pure-JAX reference mirroring the PyTorch module, for sanity checking."""
    logits = logits.astype(jnp.float32)
    logsm = jax.nn.log_softmax(logits, axis=-1)
    nll = -jnp.take_along_axis(logsm, target[:, None].astype(jnp.int32), axis=-1)
    logp = jnp.mean(nll)
    p = jnp.exp(-logp)
    return (1.0 - p) ** gamma * logp


if __name__ == "__main__":
    key = jax.random.PRNGKey(0)
    k1, k2, k3, k4 = jax.random.split(key, 4)

    # Small classification loss head, f32 logits (single grid step).
    N, C = 8, 16
    logits = jax.random.normal(k1, (N, C), dtype=jnp.float32)
    target = jax.random.randint(k2, (N,), 0, C, dtype=jnp.int32)
    loss = jax.block_until_ready(focal_loss(logits, target, gamma=2.0))
    ref = _focal_loss_ref(logits, target, gamma=2.0)
    assert jnp.allclose(loss, ref, rtol=1e-4, atol=1e-6), (loss, ref)

    # bf16 logits, non-tile-multiple batch, multi-step grid (exercises the
    # in-kernel cast, ragged-last-tile row masking and per-block partial sums).
    N2, C2 = 300, 200
    logits2 = jax.random.normal(k3, (N2, C2), dtype=jnp.bfloat16)
    target2 = jax.random.randint(k4, (N2,), 0, C2, dtype=jnp.int32)
    loss2 = jax.block_until_ready(
        focal_loss(logits2, target2, gamma=2.0, block_rows=64))
    ref2 = _focal_loss_ref(logits2, target2, gamma=2.0)
    assert jnp.allclose(loss2, ref2, rtol=1e-3, atol=1e-5), (loss2, ref2)

    print("KERNEL_OK")
</pallas_src>

<mosaic_0001>
module attributes {stable_mosaic.version = 11 : i64} {
  func.func @_focal_partial_kernel(%arg0: i32, %arg1: memref<1xi32, #tpu.memory_space<smem>>, %arg2: memref<8x16xf32, #tpu.memory_space<vmem>>, %arg3: memref<8x1xi32, #tpu.memory_space<vmem>>, %arg4: memref<1x8x128xf32, #tpu.memory_space<vmem>>) attributes {dimension_semantics = [#tpu.dimension_semantics<parallel>], iteration_bounds = array<i64: 1>, scalar_prefetch = 1 : i64, scratch_operands = 0 : i64, tpu.core_type = #tpu.core_type<tc>, window_params = [{transform_indices = @transform_0, window_bounds = array<i64: 8, 16>}, {transform_indices = @transform_1, window_bounds = array<i64: 8, 1>}, {transform_indices = @transform_2, window_bounds = array<i64: 1, 8, 128>}]} {
    %c0 = arith.constant 0 : index
    %c0_0 = arith.constant 0 : index
    %0 = vector.load %arg2[%c0, %c0_0] : memref<8x16xf32, #tpu.memory_space<vmem>>, vector<8x16xf32>
    %c0_1 = arith.constant 0 : index
    %c0_2 = arith.constant 0 : index
    %1 = vector.load %arg3[%c0_1, %c0_2] : memref<8x1xi32, #tpu.memory_space<vmem>>, vector<8x1xi32>
    %cst = arith.constant dense<0xFF800000> : vector<8xf32>
    %2 = vector.multi_reduction <maximumf>, %0, %cst [1] : vector<8x16xf32> to vector<8xf32>
    %3 = vector.shape_cast %2 : vector<8xf32> to vector<8x1xf32>
    %4 = vector.broadcast %3 : vector<8x1xf32> to vector<8x16xf32>
    %5 = arith.subf %0, %4 : vector<8x16xf32>
    %6 = math.exp %5 : vector<8x16xf32>
    %cst_3 = arith.constant dense<0.000000e+00> : vector<8xf32>
    %7 = vector.multi_reduction <add>, %6, %cst_3 [1] : vector<8x16xf32> to vector<8xf32>
    %8 = vector.shape_cast %7 : vector<8xf32> to vector<8x1xf32>
    %9 = math.log %8 : vector<8x1xf32>
    %10 = tpu.iota {dimensions = array<i32: 1>} : vector<8x16xi32>
    %11 = vector.broadcast %1 : vector<8x1xi32> to vector<8x16xi32>
    %12 = arith.cmpi eq, %10, %11 : vector<8x16xi32>
    %cst_4 = arith.constant 0.000000e+00 : f32
    %13 = vector.broadcast %cst_4 : f32 to vector<8x16xf32>
    %14 = arith.select %12, %5, %13 : vector<8x16xi1>, vector<8x16xf32>
    %cst_5 = arith.constant dense<0.000000e+00> : vector<8xf32>
    %15 = vector.multi_reduction <add>, %14, %cst_5 [1] : vector<8x16xf32> to vector<8xf32>
    %16 = vector.shape_cast %15 : vector<8xf32> to vector<8x1xf32>
    %17 = arith.subf %9, %16 : vector<8x1xf32>
    %18 = tpu.iota {dimensions = array<i32: 0>} : vector<8x1xi32>
    %c8_i32 = arith.constant 8 : i32
    %19 = arith.muli %arg0, %c8_i32 : i32
    %20 = vector.broadcast %19 : i32 to vector<8x1xi32>
    %21 = arith.addi %18, %20 : vector<8x1xi32>
    %c0_6 = arith.constant 0 : index
    %22 = memref.load %arg1[%c0_6] : memref<1xi32, #tpu.memory_space<smem>>
    %23 = vector.broadcast %22 : i32 to vector<8x1xi32>
    %24 = arith.cmpi slt, %21, %23 : vector<8x1xi32>
    %cst_7 = arith.constant 0.000000e+00 : f32
    %25 = vector.broadcast %cst_7 : f32 to vector<8x1xf32>
    %26 = arith.select %24, %17, %25 : vector<8x1xi1>, vector<8x1xf32>
    %27 = vector.shape_cast %26 : vector<8x1xf32> to vector<1x8x1xf32>
    %cst_8 = arith.constant dense<0.000000e+00> : vector<1xf32>
    %28 = vector.multi_reduction <add>, %27, %cst_8 [1, 2] : vector<1x8x1xf32> to vector<1xf32>
    %29 = vector.shape_cast %28 : vector<1xf32> to vector<1x1x1xf32>
    %30 = vector.extract %29[0, 0, 0] : f32 from vector<1x1x1xf32>
    %31 = vector.broadcast %30 : f32 to vector<1x8x128xf32>
    %c0_9 = arith.constant 0 : index
    %c0_10 = arith.constant 0 : index
    %c0_11 = arith.constant 0 : index
    %32 = vector.load %arg4[%c0_9, %c0_10, %c0_11] : memref<1x8x128xf32, #tpu.memory_space<vmem>>, vector<1x8x128xf32>
    tpu.vector_store %arg4[%c0_9, %c0_10, %c0_11], %31 {strides = array<i32>} : memref<1x8x128xf32, #tpu.memory_space<vmem>>, vector<1x8x128xf32>,
    return
  }
  func.func @transform_0(%arg0: i32, %arg1: memref<1xi32, #tpu.memory_space<smem>>) -> (i32, i32) {
    %c0_i32 = arith.constant 0 : i32
    %c0_i32_0 = arith.constant 0 : i32
    return %arg0, %c0_i32 : i32, i32
  }
  func.func @transform_1(%arg0: i32, %arg1: memref<1xi32, #tpu.memory_space<smem>>) -> (i32, i32) {
    %c0_i32 = arith.constant 0 : i32
    %c0_i32_0 = arith.constant 0 : i32
    return %arg0, %c0_i32 : i32, i32
  }
  func.func @transform_2(%arg0: i32, %arg1: memref<1xi32, #tpu.memory_space<smem>>) -> (i32, i32, i32) {
    %c0_i32 = arith.constant 0 : i32
    %c0_i32_0 = arith.constant 0 : i32
    %c0_i32_1 = arith.constant 0 : i32
    return %arg0, %c0_i32, %c0_i32_0 : i32, i32, i32
  }
}

</mosaic_0001>

<bundles_post_ra>
// kernel: tpu_custom_call.1
= control target key start
LH: loop header
LB: loop body
LE: loop exit
PB: predicated region body
PF: predicated region fallthrough
CT: control target
= control target key end

     0   :  { %vm16_vm0 = vcmask 130048   ;;  %s154_s0 = inlined_call_operand.<no memory space> [shape: s32[1], index: 0, kind: input, shape index: {}]   ;;  %s155_s1 = inlined_call_operand.vmem [shape: f32[8,16], index: 1, kind: input, shape index: {}]   ;;  %s156_s2 = inlined_call_operand.vmem [shape: s32[8,1], index: 2, kind: input, shape index: {}]   ;;  %s157_s3 = inlined_call_operand.hbm [shape: f32[1,8,128], index: 3, kind: output, shape index: {}]  }
   0x1   :  { %v14_v0 = vld [vmem:[%s155_s1] sm:$0xff] }
   0x2   :  { %9 = vsyncpa [#allocation5], 0  ;;  %v17_v1 = vsel %vm16_vm0, %v14_v0, -inf  ;;  %v108_v2 = vmov 0   ;;  %v15_v3 = vld [vmem:[%s156_s2] sm:$0xff]  ;;  %v28_v7 = vlaneseq  ;;  %v45_v16 = vstv %s154_s0  ;;  %s109_s16 = smov [#allocation4]  }
   0x3   :  { %79 = vset.pattern.permute.xlu0 %v108_v2  ;;  %vm48_vm3 = vcmask 7168   ;;  %s67_s17 = sshll.u32 %s109_s16, 4  ;;  %s68_s17 = int_to_ptr.vmem [resolvable:$true] %s67_s17 }
   0x4   :  { %18 = vmax.xlane.f32.xlu0 %v17_v1  ;;  %v29_v8 = vand.u32 127, %v28_v7  ;;  %v40_v15 = vshrl.u32 %v28_v7, 7  ;;  %s84_s18 = scalar_lea.vmem %s68_s17, 128  ;;  %p89_p1 = scmp.lt.s32.totalorder %s68_s17, %s68_s17 }
   0x5   :  { %p85_p0 = scmp.ne.s32.totalorder %s68_s17, %s84_s18  ;;  %p90_p2 = scmp.lt.s32.totalorder %s84_s18, %s84_s18 }
   0x6   :  { %vm46_vm2 = vcmp.lt.s32.totalorder %v40_v15, %v45_v16 }
   0x7   :  { %p91_p3 = por %p90_p2, %p89_p1 }
   0x9   :  { %p92_p4 = pnand %p91_p3, %p85_p0 }
  0x1a   :  { %31 = vperm.xlu0 %79, %v15_v3  }
  0x91   :  { %v19_v4 = vpop.xlane.xlu0 %18 }
  0x92   :  { %v20_v5 = vsub.f32 %v14_v0, %v19_v4 }
  0x94   :  { %v21_v6 = vmul.f32 1.442695, %v20_v5 }
  0x96   :  { %80 = vpow2.f32 %v21_v6 }
  0x99   :  { %v32_v9 = vpop.permute.xlu0 %31 }
  0x9a   :  { %vm33_vm1 = vcmp.eq.s32.totalorder %v29_v8, %v32_v9 }
  0x9b   :  { %v34_v12 = vsel %vm33_vm1, %v20_v5, 0.0 }
  0x9c   :  { %v35_v13 = vsel %vm16_vm0, %v34_v12, 0.0 }
  0xa0   :  { %v81_v10 = vpop.eup %80 }
  0xa1   :  { %v23_v11 = vsel %vm16_vm0, %v81_v10, 0.0 }
  0xa2   :  { %24 = vadd.xlane.f32.xlu1 %v23_v11 }
  0xa6   :  { %36 = vadd.xlane.f32.xlu1 %v35_v13 }
 0x12f   :  { %v25_v14 = vpop.xlane.xlu1 %24 }
 0x130   :  { %82 = vlog2.f32 %v25_v14 }
 0x133   :  { %v37_v19 = vpop.xlane.xlu1 %36 }
 0x13a   :  { %v83_v17 = vpop.eup %82 }
 0x13b   :  { %v27_v18 = vmul.f32 0.6931472, %v83_v17 }
 0x13d   :  { %v38_v20 = vsub.f32 %v27_v18, %v37_v19 }
 0x13f   :  { %v47_v21 = vsel %vm46_vm2, %v38_v20, 0.0 }
 0x140   :  { %v49_v22 = vsel %vm48_vm3, %v47_v21, 0.0 }
 0x141   :  { %50 = vadd.xlane.f32.xlu1 %v49_v22 }
 0x1ce   :  { %v51_v23 = vpop.xlane.xlu1 %50 }
 0x1cf   :  { %v52_v24 = vrot.slane %v51_v23, 4 }
 0x1d1   :  { %v53_v25 = vadd.f32 %v52_v24, %v51_v23 }
 0x1d3   :  { %v54_v26 = vrot.slane %v53_v25, 2 }
 0x1d5   :  { %v55_v27 = vadd.f32 %v54_v26, %v53_v25 }
 0x1d7   :  { %v56_v28 = vrot.slane %v55_v27, 1 }
 0x1d9   :  { %v57_v29 = vadd.f32 %v56_v28, %v55_v27 }
 0x1db   :  { %75 = vpush %v57_v29 }
 0x20c   :  { %s76_s0 = spop %75 }
 0x20d   :  { %v59_v30 = vstv %s76_s0 }
 0x20e   :  { %60 = vst [vmem:[#allocation4] sm:$0xff] %v59_v30 }
 0x20f   :  { %95 = shalt.err (!%p92_p4)
}
 0x210   :  { %s96_s21 = scalar_lea.hbm %s157_s3, 128 }
 0x211   :  { %p97_p5 = scmp.ne.s32.totalorder %s157_s3, %s96_s21  ;;  %p100_p6 = scmp.lt.u32.totalorder %s96_s21, %s157_s3 }
 0x213   :  { %p102_p7 = pnand %p100_p6, %p97_p5 }
 0x215   :  { %105 = shalt.err (!%p102_p7)
}
 0x216   :  { %70 = dma.vmem_to_hbm [thread:$0]  %s68_s17, 128, %s157_s3, [#allocation5]  }
 0x217   :  { %106 = dma.done.wait [#allocation5], 128  }
 0x218   :  { %107 = vsyncadd [#allocation5], 4294967168 }
 0x219   :  { %74 = vsyncpa [#allocation5], 1 }

</bundles_post_ra>
